<compile_context>
chip_gen: v7x
topology: tpu7x:2x2x1
jax: 0.10.0
libtpu: 0.0.40
codegen_flags: <defaults>
</compile_context>

<pallas_src>
import functools

import numpy as np
import jax
import jax.numpy as jnp
from jax.experimental import pallas as pl
from jax.experimental.pallas import tpu as pltpu

_LANES = 128
_SUBLANES = 8
_N_CORES = 2                # megacore split (v7x); harmless serial loop on v5e/v6e
_MAX_ROWS_PER_TILE = 2048   # 2048*128*4B = 1 MiB per f32 input block


def _round_up(x, m):
    return (x + m - 1) // m * m


def _charbonnier_kernel(x_ref, y_ref, out_ref, acc_ref, *, eps):
    # x_ref / y_ref: (rows_per_tile, 128) blocks in VMEM (native dtype).
    # out_ref:       (8, 128) per-core partial-sum block in VMEM.
    # acc_ref:       (8, 128) f32 VMEM scratch accumulator.
    t = pl.program_id(1)

    @pl.when(t == 0)
    def _init():
        acc_ref[...] = jnp.zeros_like(acc_ref)

    x = x_ref[...].astype(jnp.float32)
    y = y_ref[...].astype(jnp.float32)
    d = x - y
    err = jnp.sqrt(d * d + eps)
    # Per-vreg partial sums: (R,128) -> (R/8, 8, 128), add along the new major
    # axis (pure VALU vector adds; no XLU reduce in the hot loop).
    acc_ref[...] += err.reshape(-1, _SUBLANES, _LANES).sum(axis=0)

    @pl.when(t == pl.num_programs(1) - 1)
    def _finalize():
        out_ref[...] = acc_ref[...]


def l1_charbonnier_loss(X, Y, eps=1e-6):
    """mean(sqrt((X - Y)^2 + eps)) — same semantics as the PyTorch module."""
    assert X.shape == Y.shape
    n = int(np.prod(X.shape))

    rows_needed = -(-n // _LANES)
    rows_per_core = -(-rows_needed // _N_CORES)
    # Round to 16 sublanes so blocks stay tile-aligned even for bf16 inputs.
    rows_per_tile = min(_MAX_ROWS_PER_TILE, _round_up(max(rows_per_core, 1), 16))
    tiles_per_core = -(-rows_per_core // rows_per_tile)
    rows_padded = _N_CORES * tiles_per_core * rows_per_tile
    n_padded = rows_padded * _LANES

    xf = X.reshape(-1)
    yf = Y.reshape(-1)
    if n_padded != n:
        # Zero padding -> each padded element contributes exactly sqrt(eps);
        # corrected with a compile-time constant below (no in-kernel mask).
        xf = jnp.pad(xf, (0, n_padded - n))
        yf = jnp.pad(yf, (0, n_padded - n))
    x2 = xf.reshape(rows_padded, _LANES)
    y2 = yf.reshape(rows_padded, _LANES)

    kernel = functools.partial(_charbonnier_kernel, eps=float(eps))

    partials = pl.pallas_call(
        kernel,
        grid=(_N_CORES, tiles_per_core),
        in_specs=[
            pl.BlockSpec((rows_per_tile, _LANES),
                         lambda c, t: (c * tiles_per_core + t, 0)),
            pl.BlockSpec((rows_per_tile, _LANES),
                         lambda c, t: (c * tiles_per_core + t, 0)),
        ],
        out_specs=pl.BlockSpec((_SUBLANES, _LANES), lambda c, t: (c, 0)),
        out_shape=jax.ShapeDtypeStruct((_N_CORES * _SUBLANES, _LANES),
                                       jnp.float32),
        scratch_shapes=[pltpu.VMEM((_SUBLANES, _LANES), jnp.float32)],
        compiler_params=pltpu.CompilerParams(
            dimension_semantics=("parallel", "arbitrary"),
            vmem_limit_bytes=32 * 1024 * 1024),
    )(x2, y2)

    total = jnp.sum(partials, dtype=jnp.float32)
    pad_count = n_padded - n
    correction = pad_count * float(np.sqrt(eps))
    return (total - correction) / n


# ----------------------------------------------------------------------------
# Pure-JAX reference for the correctness check
# ----------------------------------------------------------------------------
def l1_charbonnier_loss_ref(X, Y, eps=1e-6):
    d = X - Y
    return jnp.mean(jnp.sqrt(d * d + eps))


# ----------------------------------------------------------------------------
if __name__ == "__main__":
    B, C, H, W = 2, 4, 16, 16
    key = jax.random.PRNGKey(0)
    kx, ky = jax.random.split(key)
    X = jax.random.normal(kx, (B, C, H, W), jnp.float32)
    Y = jax.random.normal(ky, (B, C, H, W), jnp.float32)

    loss = jax.block_until_ready(l1_charbonnier_loss(X, Y))
    ref = jax.block_until_ready(l1_charbonnier_loss_ref(X, Y))

    assert loss.shape == ()
    np.testing.assert_allclose(np.asarray(loss), np.asarray(ref),
                               rtol=1e-5, atol=1e-6)
    print("KERNEL_OK")
</pallas_src>

<mosaic_0001>
module attributes {stable_mosaic.version = 11 : i64} {
  func.func @_charbonnier_kernel(%arg0: i32, %arg1: i32, %arg2: memref<16x128xf32, #tpu.memory_space<vmem>>, %arg3: memref<16x128xf32, #tpu.memory_space<vmem>>, %arg4: memref<8x128xf32, #tpu.memory_space<vmem>>, %arg5: memref<8x128xf32, #tpu.memory_space<vmem>>) attributes {dimension_semantics = [#tpu.dimension_semantics<parallel>, #tpu.dimension_semantics<arbitrary>], iteration_bounds = array<i64: 2, 1>, scalar_prefetch = 0 : i64, scratch_operands = 1 : i64, tpu.core_type = #tpu.core_type<tc>, window_params = [{transform_indices = @transform_0, window_bounds = array<i64: 16, 128>}, {transform_indices = @transform_1, window_bounds = array<i64: 16, 128>}, {transform_indices = @transform_2, window_bounds = array<i64: 8, 128>}]} {
    %c0_i32 = arith.constant 0 : i32
    %0 = arith.cmpi eq, %arg1, %c0_i32 : i32
    %1 = arith.extui %0 : i1 to i32
    %c0_i32_0 = arith.constant 0 : i32
    %2 = arith.cmpi ne, %1, %c0_i32_0 : i32
    scf.if %2 {
      %cst_11 = arith.constant 0.000000e+00 : f32
      %18 = vector.broadcast %cst_11 : f32 to vector<8x128xf32>
      %c0_12 = arith.constant 0 : index
      %c0_13 = arith.constant 0 : index
      %19 = vector.load %arg5[%c0_12, %c0_13] : memref<8x128xf32, #tpu.memory_space<vmem>>, vector<8x128xf32>
      tpu.vector_store %arg5[%c0_12, %c0_13], %18 {strides = array<i32>} : memref<8x128xf32, #tpu.memory_space<vmem>>, vector<8x128xf32>,
    } else {
    }
    %c0 = arith.constant 0 : index
    %c0_1 = arith.constant 0 : index
    %3 = vector.load %arg2[%c0, %c0_1] : memref<16x128xf32, #tpu.memory_space<vmem>>, vector<16x128xf32>
    %c0_2 = arith.constant 0 : index
    %c0_3 = arith.constant 0 : index
    %4 = vector.load %arg3[%c0_2, %c0_3] : memref<16x128xf32, #tpu.memory_space<vmem>>, vector<16x128xf32>
    %5 = arith.subf %3, %4 : vector<16x128xf32>
    %6 = arith.mulf %5, %5 : vector<16x128xf32>
    %cst = arith.constant 9.99999997E-7 : f32
    %7 = vector.broadcast %cst : f32 to vector<16x128xf32>
    %8 = arith.addf %6, %7 : vector<16x128xf32>
    %9 = math.sqrt %8 : vector<16x128xf32>
    %c0_4 = arith.constant 0 : index
    %c0_5 = arith.constant 0 : index
    %10 = vector.load %arg5[%c0_4, %c0_5] : memref<8x128xf32, #tpu.memory_space<vmem>>, vector<8x128xf32>
    %11 = vector.shape_cast %9 : vector<16x128xf32> to vector<2x8x128xf32>
    %cst_6 = arith.constant dense<0.000000e+00> : vector<8x128xf32>
    %12 = vector.multi_reduction <add>, %11, %cst_6 [0] : vector<2x8x128xf32> to vector<8x128xf32>
    %13 = arith.addf %10, %12 : vector<8x128xf32>
    %c0_7 = arith.constant 0 : index
    %c0_8 = arith.constant 0 : index
    %14 = vector.load %arg5[%c0_7, %c0_8] : memref<8x128xf32, #tpu.memory_space<vmem>>, vector<8x128xf32>
    tpu.vector_store %arg5[%c0_7, %c0_8], %13 {strides = array<i32>} : memref<8x128xf32, #tpu.memory_space<vmem>>, vector<8x128xf32>,
    %c0_i32_9 = arith.constant 0 : i32
    %15 = arith.cmpi eq, %arg1, %c0_i32_9 : i32
    %16 = arith.extui %15 : i1 to i32
    %c0_i32_10 = arith.constant 0 : i32
    %17 = arith.cmpi ne, %16, %c0_i32_10 : i32
    scf.if %17 {
      %c0_11 = arith.constant 0 : index
      %c0_12 = arith.constant 0 : index
      %18 = vector.load %arg5[%c0_11, %c0_12] : memref<8x128xf32, #tpu.memory_space<vmem>>, vector<8x128xf32>
      %c0_13 = arith.constant 0 : index
      %c0_14 = arith.constant 0 : index
      %19 = vector.load %arg4[%c0_13, %c0_14] : memref<8x128xf32, #tpu.memory_space<vmem>>, vector<8x128xf32>
      tpu.vector_store %arg4[%c0_13, %c0_14], %18 {strides = array<i32>} : memref<8x128xf32, #tpu.memory_space<vmem>>, vector<8x128xf32>,
    } else {
    }
    return
  }
  func.func @transform_0(%arg0: i32, %arg1: i32) -> (i32, i32) {
    %c1_i32 = arith.constant 1 : i32
    %0 = arith.muli %arg0, %c1_i32 : i32
    %1 = arith.addi %0, %arg1 : i32
    %c0_i32 = arith.constant 0 : i32
    %c0_i32_0 = arith.constant 0 : i32
    return %1, %c0_i32 : i32, i32
  }
  func.func @transform_1(%arg0: i32, %arg1: i32) -> (i32, i32) {
    %c1_i32 = arith.constant 1 : i32
    %0 = arith.muli %arg0, %c1_i32 : i32
    %1 = arith.addi %0, %arg1 : i32
    %c0_i32 = arith.constant 0 : i32
    %c0_i32_0 = arith.constant 0 : i32
    return %1, %c0_i32 : i32, i32
  }
  func.func @transform_2(%arg0: i32, %arg1: i32) -> (i32, i32) {
    %c0_i32 = arith.constant 0 : i32
    %c0_i32_0 = arith.constant 0 : i32
    return %arg0, %c0_i32 : i32, i32
  }
}

</mosaic_0001>

<bundles_post_ra>
// kernel: tpu_custom_call.1
= control target key start
LH: loop header
LB: loop body
LE: loop exit
PB: predicated region body
PF: predicated region fallthrough
CT: control target
= control target key end

     0   :  { %7 = vsyncpa [#allocation4], 0  ;;  %s875_s0 = inlined_call_operand.hbm [shape: f32[32,128], index: 0, kind: input, shape index: {}]   ;;  %s876_s1 = inlined_call_operand.hbm [shape: f32[32,128], index: 1, kind: input, shape index: {}]   ;;  %s877_s2 = inlined_call_operand.hbm [shape: f32[16,128], index: 2, kind: output, shape index: {}]  }
   0x1   :  { %9 = vsyncpa [#allocation4 + $0x1], 0 }
   0x2   :  { %10 = vsyncpa [#allocation7], 0 }
   0x3   :  { %12 = vsyncpa [#allocation7 + $0x1], 0 }
   0x4   :  { %13 = vsyncpa [#allocation5], 0 }
   0x5   :  { %15 = vsyncpa [#allocation5 + $0x1], 0  ;;  %s640_s9 = smov 0   ;;  %s642_s10 = smov 0  }
   0x6   :  { %s644_s11 = smov 0   ;;  %s646_s12 = smov 0  }
   0x7   :  { %s648_s13 = smov 0   ;;  %s650_s14 = smov 0  }
   0x8 LB: > { %s379_s15 = sadd.s32 4294967295, %s618_s14   ;;  %s380_s16 = sadd.s32 4294967294, %s618_s14   ;;  %s618_s14 = sphi %s650_s14, %s21_s14   ;;  %s614_s13 = sphi %s648_s13, %s895_s13   ;;  %s610_s12 = sphi %s646_s12, %s894_s12   ;;  %s606_s11 = sphi %s644_s11, %s893_s11   ;;  %s602_s10 = sphi %s642_s10, %s892_s10   ;;  %s598_s9 = sphi %s640_s9, %s891_s9  }
   0x9   : > { %s33_s17 = sadd.s32 1, %s614_s13  ;;  %s42_s18 = sadd.s32 1, %s606_s11 }
   0xa   : > { %p35_p0 = scmp.ge.s32.totalorder %s33_s17, 2  ;;  %p49_p1 = scmp.ne.s32.totalorder %s606_s11, %s602_s10 }
   0xb   : > { %p50_p2 = scmp.eq.s32.totalorder %s618_s14, 0  ;;  %p55_p3 = scmp.ne.s32.totalorder %s602_s10, %s598_s9 }
   0xc   : > { %s897_s17 = smov (%p35_p0, %s33_s17), 0  ;;  %p56_p5 = scmp.eq.s32.totalorder %s379_s15, 0 }
   0xd   : > { %p681_p4 = por %p50_p2, %p49_p1  ;;  %s39_s20 = ssub.s32 %s614_s13, %s897_s17 }
   0xe   : > { %p107_p6 = scmp.eq.s32.totalorder %s379_s15, 1  ;;  %p40_p7 = scmp.eq.s32.totalorder %s39_s20, 0 }
   0xf   : > { %p687_p8 = por %p56_p5, %p55_p3  ;;  %p113_p10 = scmp.eq.s32.totalorder %s380_s16, 1 }
  0x10   : > { %p691_p9 = por %p107_p6, %p49_p1  ;;  %p416_p13 = scmp.lt.s32.totalorder %s618_s14, 2 }
  0x11   : > { %s881_s21 = scalar_select %p687_p8, 1, 0 }
  0x12   : > { %s882_s22 = scalar_select %p691_p9, 1, 0 }
  0x13   : > { %s696_s23 = scalar_select %p40_p7, %s606_s11, %s42_s18  }
  0x14   : > { %p698_p11 = por %p113_p10, %p55_p3  ;;  %s705_s25 = sand.u32 1, %s606_s11  }
  0x15   : > { %s383_s26 = sshll.u32 %s705_s25, 4  ;;  %s397_s27 = sshll.u32 %s614_s13, 8 }
  0x16   : > { %s883_s24 = scalar_select %p698_p11, 1, 0 }
  0x17   : > { %s714_s30 = scalar_lea.hbm %s875_s0, %s397_s27  ;;  %s137_s3 = scalar_lea.vmem [#allocation3], %s383_s26 }
  0x18   : > { %s145_s4 = sshll.u32 %s137_s3, 4  ;;  %p722_p0 = pnand %p416_p13, %p681_p4  ;;  %s718_s4 = int_to_ptr.vmem [resolvable:$true] %s145_s4 }
  0x19   : > { %s134_s6 = scalar_lea.sflag [#allocation4], %s705_s25  ;;  %s472_s7 = scalar_lea.hbm %s714_s30, 256 }
  0x1a   : > { %p473_p2 = scmp.ne.s32.totalorder %s714_s30, %s472_s7  ;;  %p474_p3 = pneg %p722_p0 }
  0x1b   : > { %s477_s16 = scalar_lea.hbm %s875_s0, 512  ;;  %p478_p4 = scmp.lt.u32.totalorder %s714_s30, %s875_s0 }
  0x1c   : > { %p475_p5 = pnand %p474_p3, %p473_p2  ;;  %p479_p7 = scmp.lt.u32.totalorder %s477_s16, %s472_s7 }
  0x1d   : > { %p481_p13 = scmp.lt.u32.totalorder %s472_s7, %s714_s30 }
  0x1e   : > { %p476_p6 = pneg %p475_p5  ;;  %p480_p10 = por %p479_p7, %p478_p4 }
  0x20   : > { %p482_p12 = por %p481_p13, %p480_p10 }
  0x22   : > { %p483_p1 = pnand %p482_p12, %p476_p6 }
  0x24   : > { %486 = shalt.err (!%p483_p1)
}
  0x25   : > { %s487_s20 = scalar_lea.vmem %s718_s4, 256  ;;  %s620_s28 = smov [#allocation3]  }
  0x26   : > { %p488_p2 = scmp.ne.s32.totalorder %s718_s4, %s487_s20  ;;  %s492_s29 = sshll.u32 %s620_s28, 4  ;;  %s493_s29 = int_to_ptr.vmem [resolvable:$false] %s492_s29 }
  0x27   : > { %s494_s3 = scalar_lea.vmem %s493_s29, 512  ;;  %p495_p9 = scmp.lt.s32.totalorder %s718_s4, %s493_s29 }
  0x28   : > { %p490_p5 = pnand %p488_p2, %p474_p3  ;;  %p496_p4 = scmp.lt.s32.totalorder %s494_s3, %s487_s20 }
  0x2a   : > { %p491_p11 = pneg %p490_p5  ;;  %p497_p7 = por %p496_p4, %p495_p9 }
  0x2c   : > { %p498_p10 = pnand %p497_p7, %p491_p11 }
  0x2e   : > { %501 = shalt.err (!%p498_p10)
}
  0x2f   : > { %s621_s7 = smov 128   ;;  %s622_s8 = smov 8  }
  0x30   : > { %408 = dma.hbm_to_vmem [thread:$0]  (!%p722_p0), %s714_s30, 256, %s718_s4, %s134_s6, %s621_s7, %s621_s7, %s622_s8  }
  0x31   : > { %p175_p9 = scmp.lt.s32.totalorder %s618_s14, 3  ;;  %s764_s18 = scalar_lea.hbm %s876_s1, %s397_s27 }
  0x32   : > { %p885_p11 = scmp.ge.s32.totalorder %s618_s14, 1  ;;  %s159_s20 = scalar_lea.vmem [#allocation6], %s383_s26 }
  0x33   : > { %s167_s28 = sshll.u32 %s159_s20, 4  ;;  %s156_s30 = scalar_lea.sflag [#allocation7], %s705_s25  ;;  %s774_s28 = int_to_ptr.vmem [resolvable:$true] %s167_s28 }
  0x34   : > { %p768_p12 = pnand %p885_p11, %p175_p9  ;;  %s502_s4 = scalar_lea.hbm %s764_s18, 256 }
  0x35   : > { %p503_p1 = scmp.ne.s32.totalorder %s764_s18, %s502_s4  ;;  %s507_s29 = scalar_lea.hbm %s876_s1, 512 }
  0x36   : > { %p508_p2 = scmp.lt.u32.totalorder %s764_s18, %s876_s1  ;;  %p509_p5 = scmp.lt.u32.totalorder %s507_s29, %s502_s4 }
  0x37   : > { %p505_p6 = pnand %p503_p1, %p474_p3  ;;  %p511_p7 = scmp.lt.u32.totalorder %s502_s4, %s764_s18 }
  0x38   : > { %p510_p4 = por %p509_p5, %p508_p2 }
  0x39   : > { %p506_p13 = pneg %p505_p6 }
  0x3a   : > { %p512_p10 = por %p511_p7, %p510_p4 }
  0x3c   : > { %p513_p9 = pnand %p512_p10, %p506_p13 }
  0x3e   : > { %516 = shalt.err (!%p513_p9)
}
  0x3f   : > { %s517_s26 = scalar_lea.vmem %s774_s28, 256  ;;  %s623_s16 = smov [#allocation6]  }
  0x40   : > { %p518_p11 = scmp.ne.s32.totalorder %s774_s28, %s517_s26  ;;  %s522_s20 = sshll.u32 %s623_s16, 4  ;;  %s523_s20 = int_to_ptr.vmem [resolvable:$false] %s522_s20 }
  0x41   : > { %s524_s27 = scalar_lea.vmem %s523_s20, 512  ;;  %p525_p8 = scmp.lt.s32.totalorder %s774_s28, %s523_s20 }
  0x42   : > { %p520_p1 = pnand %p518_p11, %p474_p3  ;;  %p526_p2 = scmp.lt.s32.totalorder %s524_s27, %s517_s26 }
  0x44   : > { %p521_p6 = pneg %p520_p1  ;;  %p527_p5 = por %p526_p2, %p525_p8 }
  0x46   : > { %p528_p4 = pnand %p527_p5, %p521_p6 }
  0x48   : > { %531 = shalt.err (!%p528_p4)
}
  0x49   : > { %411 = dma.hbm_to_vmem [thread:$0]  (!%p722_p0), %s764_s18, 256, %s774_s28, %s156_s30, %s621_s7, %s621_s7, %s622_s8  }
  0x4a   : > { %179 = sbr.rel (%p768_p12) target bundleno = 124 (0x7c), region = 28  ;;  %s808_s4 = sand.u32 (!%p768_p12), 1, %s602_s10  }
  0x4b   : > { %s390_s6 = sshll.u32 (!%p768_p12), %s808_s4, 4  ;;  %s182_s29 = scalar_lea.sflag (!%p768_p12), [#allocation4], %s808_s4 }
  0x4c   : > { %s185_s5 = scalar_lea.vmem (!%p768_p12), [#allocation3], %s390_s6  ;;  %p887_p8 = scmp.ne.s32.totalorder (!%p768_p12), %s881_s21, 0 }
  0x51   : > { %585 = dma.done.wait (%p887_p8), %s182_s29, 256  }
  0x52   : > { %587 = vsyncadd (%p887_p8), %s182_s29, 4294967040  ;;  %s191_s25 = scalar_lea.sflag [#allocation7], %s808_s4  ;;  %s194_s7 = scalar_lea.vmem [#allocation6], %s390_s6 }
  0x53   : > { %589 = dma.done.wait (%p887_p8), %s191_s25, 256  }
  0x54   : > { %591 = vsyncadd (%p887_p8), %s191_s25, 4294967040  ;;  %v229_v0 = vld [vmem:[%s185_s5] sm:$0xff]  ;;  %v230_v1 = vld [vmem:[%s185_s5 + $0x8] sm:$0xff]  ;;  %s392_s8 = sshll.u32 %s808_s4, 3  ;;  %s394_s19 = sshll.u32 %s610_s12, 7 }
  0x55   : > { %v231_v2 = vld [vmem:[%s194_s7] sm:$0xff]  ;;  %v232_v3 = vld [vmem:[%s194_s7 + $0x8] sm:$0xff]  ;;  %s219_s21 = scalar_lea.vmem [#allocation8], %s392_s8  ;;  %s828_s3 = scalar_lea.hbm %s877_s2, %s394_s19 }
  0x56   : > { %v233_v4 = vsub.f32 %v229_v0, %v231_v2  ;;  %v234_v5 = vsub.f32 %v230_v1, %v232_v3  ;;  %s276_s18 = sshll.u32 %s219_s21, 4  ;;  %s263_s15 = scalar_lea.sflag [#allocation5], %s808_s4  ;;  %s823_s18 = int_to_ptr.vmem [resolvable:$true] %s276_s18 }
  0x57   : > { %s532_s26 = scalar_lea.vmem %s823_s18, 128  ;;  %p888_p3 = scmp.ne.s32.totalorder %s882_s22, 0 }
  0x58   : > { %v235_v6 = vmul.f32 %v233_v4, %v233_v4  ;;  %v236_v7 = vmul.f32 %v234_v5, %v234_v5  ;;  %p533_p0 = scmp.ne.s32.totalorder %s823_s18, %s532_s26  ;;  %s624_s12 = smov [#allocation8]  }
  0x59   : > { %s536_s16 = sshll.u32 %s624_s12, 4  ;;  %s537_s16 = int_to_ptr.vmem [resolvable:$false] %s536_s16 }
  0x5a   : > { %v237_v8 = vadd.f32 1e-06, %v235_v6  ;;  %v238_v9 = vadd.f32 1e-06, %v236_v7  ;;  %p534_p12 = pnand %p533_p0, %p888_p3  ;;  %s538_s20 = scalar_lea.vmem %s537_s16, 256 }
  0x5b   : > { %p539_p7 = scmp.lt.s32.totalorder %s823_s18, %s537_s16  ;;  %p540_p10 = scmp.lt.s32.totalorder %s538_s20, %s532_s26 }
  0x5c   : > { %468 = vrsqrt.f32 %v237_v8  ;;  %vm241_vm0 = vcmp.eq.f32.partialorder %v237_v8, inf  ;;  %v244_v11 = vand.u32 2147483648, %v237_v8  ;;  %vm243_vm1 = vcmp.eq.f32.partialorder %v237_v8, 0.0  ;;  %p535_p13 = pneg %p534_p12 }
  0x5d   : > { %470 = vrsqrt.f32 %v238_v9  ;;  %vm248_vm2 = vcmp.eq.f32.partialorder %v238_v9, inf  ;;  %v251_v14 = vand.u32 2147483648, %v238_v9  ;;  %vm250_vm3 = vcmp.eq.f32.partialorder %v238_v9, 0.0  ;;  %p541_p9 = por %p540_p10, %p539_p7 }
  0x5f   : > { %p542_p11 = pnand %p541_p9, %p535_p13 }
  0x66   : > { %v469_v10 = vpop.eup %468 }
  0x67   : > { %v471_v12 = vpop.eup %470  ;;  %v240_v13 = vmul.f32 %v469_v10, %v237_v8 }
  0x68   : > { %v247_v15 = vmul.f32 %v471_v12, %v238_v9 }
  0x69   : > { %v242_v16 = vsel %vm241_vm0, %v237_v8, %v240_v13 }
  0x6a   : > { %v245_v17 = vsel %vm243_vm1, %v244_v11, %v242_v16  ;;  %v249_v18 = vsel %vm248_vm2, %v238_v9, %v247_v15 }
  0x6b   : > { %v252_v19 = vsel %vm250_vm3, %v251_v14, %v249_v18 }
  0x6c   : > { %v254_v20 = vadd.f32 %v252_v19, %v245_v17 }
  0x6e   : > { %261 = vst [vmem:[%s219_s21] sm:$0xff] %v254_v20 }
  0x6f   : > { %545 = shalt.err (!%p542_p11)
}
  0x70   : > { %s546_s27 = scalar_lea.hbm %s828_s3, 128  ;;  %s550_s29 = scalar_lea.hbm %s877_s2, 256 }
  0x71   : > { %p547_p1 = scmp.ne.s32.totalorder %s828_s3, %s546_s27  ;;  %p551_p5 = scmp.lt.u32.totalorder %s828_s3, %s877_s2 }
  0x72   : > { %p552_p4 = scmp.lt.u32.totalorder %s550_s29, %s546_s27  ;;  %p554_p0 = scmp.lt.u32.totalorder %s546_s27, %s828_s3 }
  0x73   : > { %p548_p6 = pnand %p547_p1, %p888_p3 }
  0x74   : > { %p553_p8 = por %p552_p4, %p551_p5 }
  0x75   : > { %p549_p2 = pneg %p548_p6 }
  0x76   : > { %p555_p12 = por %p554_p0, %p553_p8 }
  0x78   : > { %p556_p13 = pnand %p555_p12, %p549_p2 }
  0x7a   : > { %559 = shalt.err (!%p556_p13)
}
  0x7b   : > { %403 = dma.vmem_to_hbm [thread:$0]  (%p888_p3), %s823_s18, 128, %s828_s3, %s263_s15  }
  0x7c PF: > { %s288_s7 = sand.u32 1, %s598_s9   ;;  %p889_p7 = scmp.ne.s32.totalorder %s883_s24, 0 }
  0x7d   : > { %p890_p10 = scmp.ge.s32.totalorder %s618_s14, 2  ;;  %s289_s8 = scalar_lea.sflag [#allocation5], %s288_s7 }
  0x7f   : > { %p413_p9 = pnand %p890_p10, %p889_p7 }
  0x81   : > { %593 = dma.done.wait (!%p413_p9), %s289_s8, 128  }
  0x82   : > { %595 = vsyncadd (!%p413_p9), %s289_s8, 4294967168  ;;  %s21_s14 = sadd.s32 1, %s618_s14   ;;  %s891_s9 = smov %s602_s10 }
  0x83   : > { %p18_p11 = scmp.ge.s32.totalorder %s21_s14, 4   ;;  %s892_s10 = smov %s606_s11 }
  0x84   : > { %s893_s11 = smov %s696_s23  ;;  %s894_s12 = smov %s614_s13 }
  0x85   : > { %s895_s13 = smov %s897_s17  ;;  %20 = sbr.rel (!%p18_p11) target bundleno = 8 (0x8), region = 94 }
  0x8c   :  { %294 = vsyncpa [#allocation4], 1 }
  0x8d   :  { %296 = vsyncpa [#allocation4 + $0x1], 1 }
  0x8e   :  { %297 = vsyncpa [#allocation7], 1 }
  0x8f   :  { %299 = vsyncpa [#allocation7 + $0x1], 1 }
  0x90   :  { %300 = vsyncpa [#allocation5], 1 }
  0x91   :  { %302 = vsyncpa [#allocation5 + $0x1], 1 }

</bundles_post_ra>
